<compile_context>
chip_gen: v5e
topology: v5e:2x2
jax: 0.10.0
libtpu: 0.0.40
codegen_flags: <defaults>
</compile_context>

<pallas_src>
import functools

import jax
import jax.numpy as jnp
from jax import lax
from jax.experimental import pallas as pl
from jax.experimental.pallas import tpu as pltpu


def _gn_main_kernel(x_ref, a_ref, wnbr_ref, wself_ref, bias_ref, alpha_ref,
                    y_ref, stats_ref, acc_ref):
    i = pl.program_id(0)          # row tile of the output / adjacency
    k = pl.program_id(1)          # contraction (neighbor) tile

    @pl.when(k == 0)
    def _init():
        # Seed the accumulator with the broadcast bias: h = ... + b.
        acc_ref[...] = jnp.broadcast_to(bias_ref[...], acc_ref.shape)

    # Neighbor-message projection of this contraction chunk (bf16 MXU, f32 out).
    # x chunk is tiny [tm, indim]; recomputing per row tile keeps HBM traffic
    # dominated by the adjacency tile alone (memory-bound regime).
    msg = jnp.dot(x_ref[...], wnbr_ref[...],
                  preferred_element_type=jnp.float32).astype(jnp.bfloat16)
    acc_ref[...] += jnp.dot(a_ref[...], msg, preferred_element_type=jnp.float32)

    @pl.when(k == i)
    def _self_term():
        # Self connection W_self x_i (the x block indexed by k equals x_i here).
        acc_ref[...] += jnp.dot(x_ref[...], wself_ref[...],
                                preferred_element_type=jnp.float32)

    @pl.when(k == pl.num_programs(1) - 1)
    def _finalize():
        h = acc_ref[...]
        alpha = alpha_ref[0, 0]                       # PReLU shared alpha (SMEM)
        y = jnp.where(h >= 0.0, h, alpha * h)
        y_ref[...] = y
        # One-pass per-tile BatchNorm partial statistics: [sum(y), sum(y*y)].
        s1 = jnp.sum(y, axis=0, keepdims=True)
        s2 = jnp.sum(y * y, axis=0, keepdims=True)
        stats_ref[...] = jnp.concatenate([s1, s2], axis=0)[None]


def _bn_apply_kernel(y_ref, scale_ref, shift_ref, o_ref):
    # Lane-dense elementwise BatchNorm application: out = y * scale + shift.
    o_ref[...] = y_ref[...] * scale_ref[...] + shift_ref[...]


@functools.partial(jax.jit, static_argnames=("eps", "block_rows"))
def gn_block(x, edge_index, params, edge_attr=None, *, eps=1e-5, block_rows=None):
    """x: [N, indim] f32, edge_index: [2, E] int32 (row 0 = src, row 1 = dst)."""
    n, indim = x.shape
    outdim = params["w_self"].shape[1]
    out_pad = pl.cdiv(outdim, 128) * 128              # lane-dense padded width

    # ---- glue: dense weighted adjacency (messages j -> i), bf16 for the MXU ----
    src, dst = edge_index[0], edge_index[1]
    if edge_attr is None:
        ew = jnp.ones((edge_index.shape[1],), jnp.float32)
    else:
        ew = edge_attr.reshape(-1).astype(jnp.float32)
    adj = jnp.zeros((n, n), jnp.float32).at[dst, src].add(ew).astype(jnp.bfloat16)

    # ---- pad params to lane-dense width ----
    def _pad_cols(w):
        return jnp.pad(w.astype(jnp.float32), ((0, 0), (0, out_pad - w.shape[1])))

    w_nbr = _pad_cols(params["w_nbr"]).astype(jnp.bfloat16)      # [indim, out_pad]
    w_self = _pad_cols(params["w_self"]).astype(jnp.bfloat16)    # [indim, out_pad]
    bias = _pad_cols(params["bias"].reshape(1, outdim))          # [1, out_pad]
    gamma = _pad_cols(params["gamma"].reshape(1, outdim))        # [1, out_pad]
    beta = _pad_cols(params["beta"].reshape(1, outdim))          # [1, out_pad]
    alpha = params["alpha"].reshape(1, 1).astype(jnp.float32)    # PReLU scalar
    x_bf16 = x.astype(jnp.bfloat16)

    # ---- tile choice: tm == tk, must divide N and satisfy the (8,128) rule ----
    if (block_rows is not None and n % block_rows == 0
            and (block_rows % 128 == 0 or block_rows == n)):
        tm = block_rows
    else:
        tm = next((t for t in (512, 256, 128) if n % t == 0), n)
    n_tiles = n // tm

    y, stats = pl.pallas_call(
        _gn_main_kernel,
        out_shape=(
            jax.ShapeDtypeStruct((n, out_pad), jnp.float32),          # PReLU(conv(x))
            jax.ShapeDtypeStruct((n_tiles, 2, out_pad), jnp.float32),  # BN partials
        ),
        grid=(n_tiles, n_tiles),
        in_specs=[
            pl.BlockSpec((tm, indim), lambda i, k: (k, 0)),           # x (contraction chunk)
            pl.BlockSpec((tm, tm), lambda i, k: (i, k)),              # adjacency tile
            pl.BlockSpec((indim, out_pad), lambda i, k: (0, 0)),      # W_nbr (resident)
            pl.BlockSpec((indim, out_pad), lambda i, k: (0, 0)),      # W_self (resident)
            pl.BlockSpec((1, out_pad), lambda i, k: (0, 0)),          # bias
            pl.BlockSpec(memory_space=pltpu.MemorySpace.SMEM),        # PReLU alpha
        ],
        out_specs=(
            pl.BlockSpec((tm, out_pad), lambda i, k: (i, 0)),
            pl.BlockSpec((1, 2, out_pad), lambda i, k: (i, 0, 0)),
        ),
        scratch_shapes=[pltpu.VMEM((tm, out_pad), jnp.float32)],
        compiler_params=pltpu.CompilerParams(
            dimension_semantics=("parallel", "arbitrary")),
    )(x_bf16, adj, w_nbr, w_self, bias, alpha)

    # ---- tiny JAX glue: combine per-tile stats into per-channel scale/shift ----
    s = stats.sum(axis=0)                               # [2, out_pad]
    mean = s[0] / n
    var = jnp.maximum(s[1] / n - mean * mean, 0.0)      # biased var (PyTorch norm)
    inv_std = lax.rsqrt(var + eps)
    scale = gamma * inv_std                             # [1, out_pad]
    shift = beta - mean * scale                         # [1, out_pad]

    out = pl.pallas_call(
        _bn_apply_kernel,
        out_shape=jax.ShapeDtypeStruct((n, out_pad), jnp.float32),
        grid=(n_tiles,),
        in_specs=[
            pl.BlockSpec((tm, out_pad), lambda i: (i, 0)),
            pl.BlockSpec((1, out_pad), lambda i: (0, 0)),
            pl.BlockSpec((1, out_pad), lambda i: (0, 0)),
        ],
        out_specs=pl.BlockSpec((tm, out_pad), lambda i: (i, 0)),
        compiler_params=pltpu.CompilerParams(dimension_semantics=("parallel",)),
    )(y, scale, shift)

    return out[:, :outdim]


def _reference(x, edge_index, params, edge_attr=None, eps=1e-5):
    """Pure-JAX f32 reference (honors edge_attr)."""
    n = x.shape[0]
    src, dst = edge_index[0], edge_index[1]
    if edge_attr is None:
        ew = jnp.ones((edge_index.shape[1],), jnp.float32)
    else:
        ew = edge_attr.reshape(-1).astype(jnp.float32)
    adj = jnp.zeros((n, n), jnp.float32).at[dst, src].add(ew)
    h = x @ params["w_self"] + adj @ (x @ params["w_nbr"]) + params["bias"]
    a = params["alpha"][0]
    y = jnp.where(h >= 0, h, a * h)
    mean = y.mean(axis=0, keepdims=True)
    var = ((y - mean) ** 2).mean(axis=0, keepdims=True)
    return params["gamma"] * (y - mean) / jnp.sqrt(var + eps) + params["beta"]


if __name__ == "__main__":
    key = jax.random.PRNGKey(0)
    kx, ke, ka, kw1, kw2, kb, kg, kbt, kx2, ke2 = jax.random.split(key, 10)

    INDIM, OUTDIM = 8, 32
    params = {
        "w_self": 0.1 * jax.random.normal(kw1, (INDIM, OUTDIM), jnp.float32),
        "w_nbr": 0.1 * jax.random.normal(kw2, (INDIM, OUTDIM), jnp.float32),
        "bias": 0.01 * jax.random.normal(kb, (OUTDIM,), jnp.float32),
        "alpha": jnp.full((1,), 0.25, jnp.float32),                # PReLU default
        "gamma": 1.0 + 0.1 * jax.random.normal(kg, (OUTDIM,), jnp.float32),
        "beta": 0.1 * jax.random.normal(kbt, (OUTDIM,), jnp.float32),
    }

    # Config A: edge-weighted graph, multi-tile (2 x 2) grid path.
    N, E = 256, 2048
    x = jax.random.normal(kx, (N, INDIM), jnp.float32)
    edge_index = jax.random.randint(ke, (2, E), 0, N, dtype=jnp.int32)
    edge_attr = jax.random.uniform(ka, (E,), jnp.float32, minval=0.5, maxval=1.5)

    out = jax.block_until_ready(
        gn_block(x, edge_index, params, edge_attr, block_rows=128))
    ref = _reference(x, edge_index, params, edge_attr)
    assert out.shape == (N, OUTDIM)
    err = float(jnp.max(jnp.abs(out - ref)))
    assert jnp.allclose(out, ref, atol=5e-2, rtol=5e-2), \
        f"config A mismatch vs JAX reference (max |err|={err})"

    # Config B: small unweighted graph, single-tile fallback path.
    N2, E2 = 64, 256
    x2 = jax.random.normal(kx2, (N2, INDIM), jnp.float32)
    edge_index2 = jax.random.randint(ke2, (2, E2), 0, N2, dtype=jnp.int32)
    out2 = jax.block_until_ready(gn_block(x2, edge_index2, params))
    ref2 = _reference(x2, edge_index2, params)
    assert out2.shape == (N2, OUTDIM)
    err2 = float(jnp.max(jnp.abs(out2 - ref2)))
    assert jnp.allclose(out2, ref2, atol=5e-2, rtol=5e-2), \
        f"config B mismatch vs JAX reference (max |err|={err2})"

    print("KERNEL_OK")
</pallas_src>

<mosaic_0001>
module attributes {stable_mosaic.version = 11 : i64} {
  func.func @_bn_apply_kernel(%arg0: i32, %arg1: memref<128x128xf32, #tpu.memory_space<vmem>>, %arg2: memref<1x128xf32, #tpu.memory_space<vmem>>, %arg3: memref<1x128xf32, #tpu.memory_space<vmem>>, %arg4: memref<128x128xf32, #tpu.memory_space<vmem>>) attributes {dimension_semantics = [#tpu.dimension_semantics<parallel>], iteration_bounds = array<i64: 2>, scalar_prefetch = 0 : i64, scratch_operands = 0 : i64, tpu.core_type = #tpu.core_type<tc>, window_params = [{transform_indices = @transform_0, window_bounds = array<i64: 128, 128>}, {pipeline_mode = #tpu.pipeline_mode<synchronous>, transform_indices = @transform_1, window_bounds = array<i64: 1, 128>}, {pipeline_mode = #tpu.pipeline_mode<synchronous>, transform_indices = @transform_2, window_bounds = array<i64: 1, 128>}, {transform_indices = @transform_3, window_bounds = array<i64: 128, 128>}]} {
    %c0 = arith.constant 0 : index
    %c0_0 = arith.constant 0 : index
    %0 = vector.load %arg1[%c0, %c0_0] : memref<128x128xf32, #tpu.memory_space<vmem>>, vector<128x128xf32>
    %c0_1 = arith.constant 0 : index
    %c0_2 = arith.constant 0 : index
    %1 = vector.load %arg2[%c0_1, %c0_2] : memref<1x128xf32, #tpu.memory_space<vmem>>, vector<1x128xf32>
    %2 = vector.broadcast %1 : vector<1x128xf32> to vector<128x128xf32>
    %3 = arith.mulf %0, %2 : vector<128x128xf32>
    %c0_3 = arith.constant 0 : index
    %c0_4 = arith.constant 0 : index
    %4 = vector.load %arg3[%c0_3, %c0_4] : memref<1x128xf32, #tpu.memory_space<vmem>>, vector<1x128xf32>
    %5 = vector.broadcast %4 : vector<1x128xf32> to vector<128x128xf32>
    %6 = arith.addf %3, %5 : vector<128x128xf32>
    %c0_5 = arith.constant 0 : index
    %c0_6 = arith.constant 0 : index
    %7 = vector.load %arg4[%c0_5, %c0_6] : memref<128x128xf32, #tpu.memory_space<vmem>>, vector<128x128xf32>
    tpu.vector_store %arg4[%c0_5, %c0_6], %6 {strides = array<i32>} : memref<128x128xf32, #tpu.memory_space<vmem>>, vector<128x128xf32>,
    return
  }
  func.func @transform_0(%arg0: i32) -> (i32, i32) {
    %c0_i32 = arith.constant 0 : i32
    %c0_i32_0 = arith.constant 0 : i32
    return %arg0, %c0_i32 : i32, i32
  }
  func.func @transform_1(%arg0: i32) -> (i32, i32) {
    %c0_i32 = arith.constant 0 : i32
    %c0_i32_0 = arith.constant 0 : i32
    %c0_i32_1 = arith.constant 0 : i32
    return %c0_i32, %c0_i32_0 : i32, i32
  }
  func.func @transform_2(%arg0: i32) -> (i32, i32) {
    %c0_i32 = arith.constant 0 : i32
    %c0_i32_0 = arith.constant 0 : i32
    %c0_i32_1 = arith.constant 0 : i32
    return %c0_i32, %c0_i32_0 : i32, i32
  }
  func.func @transform_3(%arg0: i32) -> (i32, i32) {
    %c0_i32 = arith.constant 0 : i32
    %c0_i32_0 = arith.constant 0 : i32
    return %arg0, %c0_i32 : i32, i32
  }
}

module attributes {stable_mosaic.version = 11 : i64} {
  func.func @_gn_main_kernel(%arg0: i32, %arg1: i32, %arg2: memref<128x8xbf16, #tpu.memory_space<vmem>>, %arg3: memref<128x128xbf16, #tpu.memory_space<vmem>>, %arg4: memref<8x128xbf16, #tpu.memory_space<vmem>>, %arg5: memref<8x128xbf16, #tpu.memory_space<vmem>>, %arg6: memref<1x128xf32, #tpu.memory_space<vmem>>, %arg7: memref<1x1xf32, #tpu.memory_space<smem>>, %arg8: memref<128x128xf32, #tpu.memory_space<vmem>>, %arg9: memref<1x2x128xf32, #tpu.memory_space<vmem>>, %arg10: memref<128x128xf32, #tpu.memory_space<vmem>>) attributes {dimension_semantics = [#tpu.dimension_semantics<parallel>, #tpu.dimension_semantics<arbitrary>], iteration_bounds = array<i64: 2, 2>, scalar_prefetch = 0 : i64, scratch_operands = 1 : i64, tpu.core_type = #tpu.core_type<tc>, window_params = [{transform_indices = @transform_0, window_bounds = array<i64: 128, 8>}, {transform_indices = @transform_1, window_bounds = array<i64: 128, 128>}, {pipeline_mode = #tpu.pipeline_mode<synchronous>, transform_indices = @transform_2, window_bounds = array<i64: 8, 128>}, {pipeline_mode = #tpu.pipeline_mode<synchronous>, transform_indices = @transform_3, window_bounds = array<i64: 8, 128>}, {pipeline_mode = #tpu.pipeline_mode<synchronous>, transform_indices = @transform_4, window_bounds = array<i64: 1, 128>}, {transform_indices = @transform_5, window_bounds = array<i64: 1, 1>}, {transform_indices = @transform_6, window_bounds = array<i64: 128, 128>}, {transform_indices = @transform_7, window_bounds = array<i64: 1, 2, 128>}]} {
    %c0_i32 = arith.constant 0 : i32
    %0 = arith.cmpi eq, %arg1, %c0_i32 : i32
    %1 = arith.extui %0 : i1 to i32
    %c0_i32_0 = arith.constant 0 : i32
    %2 = arith.cmpi ne, %1, %c0_i32_0 : i32
    scf.if %2 {
      %c0_13 = arith.constant 0 : index
      %c0_14 = arith.constant 0 : index
      %18 = vector.load %arg6[%c0_13, %c0_14] : memref<1x128xf32, #tpu.memory_space<vmem>>, vector<1x128xf32>
      %19 = vector.shape_cast %18 : vector<1x128xf32> to vector<1x128xf32>
      %20 = vector.broadcast %19 : vector<1x128xf32> to vector<128x128xf32>
      %c0_15 = arith.constant 0 : index
      %c0_16 = arith.constant 0 : index
      %21 = vector.load %arg10[%c0_15, %c0_16] : memref<128x128xf32, #tpu.memory_space<vmem>>, vector<128x128xf32>
      tpu.vector_store %arg10[%c0_15, %c0_16], %20 {strides = array<i32>} : memref<128x128xf32, #tpu.memory_space<vmem>>, vector<128x128xf32>,
    } else {
    }
    %c0 = arith.constant 0 : index
    %c0_1 = arith.constant 0 : index
    %3 = vector.load %arg2[%c0, %c0_1] : memref<128x8xbf16, #tpu.memory_space<vmem>>, vector<128x8xbf16>
    %c0_2 = arith.constant 0 : index
    %c0_3 = arith.constant 0 : index
    %4 = vector.load %arg4[%c0_2, %c0_3] : memref<8x128xbf16, #tpu.memory_space<vmem>>, vector<8x128xbf16>
    %cst = arith.constant dense<0.000000e+00> : vector<128x128xf32>
    %5 = tpu.matmul %3, %4, %cst {dimension_numbers = #tpu.dot_dimension_numbers<[1], [0], [0], [1], [0, 0, 1, 1], [], []>} : vector<128x8xbf16>, vector<8x128xbf16>, vector<128x128xf32> -> vector<128x128xf32>
    %6 = arith.truncf %5 : vector<128x128xf32> to vector<128x128xbf16>
    %c0_4 = arith.constant 0 : index
    %c0_5 = arith.constant 0 : index
    %7 = vector.load %arg10[%c0_4, %c0_5] : memref<128x128xf32, #tpu.memory_space<vmem>>, vector<128x128xf32>
    %c0_6 = arith.constant 0 : index
    %c0_7 = arith.constant 0 : index
    %8 = vector.load %arg3[%c0_6, %c0_7] : memref<128x128xbf16, #tpu.memory_space<vmem>>, vector<128x128xbf16>
    %cst_8 = arith.constant dense<0.000000e+00> : vector<128x128xf32>
    %9 = tpu.matmul %8, %6, %cst_8 {dimension_numbers = #tpu.dot_dimension_numbers<[1], [0], [0], [1], [0, 0, 1, 1], [], []>} : vector<128x128xbf16>, vector<128x128xbf16>, vector<128x128xf32> -> vector<128x128xf32>
    %10 = arith.addf %7, %9 : vector<128x128xf32>
    %c0_9 = arith.constant 0 : index
    %c0_10 = arith.constant 0 : index
    %11 = vector.load %arg10[%c0_9, %c0_10] : memref<128x128xf32, #tpu.memory_space<vmem>>, vector<128x128xf32>
    tpu.vector_store %arg10[%c0_9, %c0_10], %10 {strides = array<i32>} : memref<128x128xf32, #tpu.memory_space<vmem>>, vector<128x128xf32>,
    %12 = arith.cmpi eq, %arg1, %arg0 : i32
    %13 = arith.extui %12 : i1 to i32
    %c0_i32_11 = arith.constant 0 : i32
    %14 = arith.cmpi ne, %13, %c0_i32_11 : i32
    scf.if %14 {
      %c0_13 = arith.constant 0 : index
      %c0_14 = arith.constant 0 : index
      %18 = vector.load %arg10[%c0_13, %c0_14] : memref<128x128xf32, #tpu.memory_space<vmem>>, vector<128x128xf32>
      %c0_15 = arith.constant 0 : index
      %c0_16 = arith.constant 0 : index
      %19 = vector.load %arg2[%c0_15, %c0_16] : memref<128x8xbf16, #tpu.memory_space<vmem>>, vector<128x8xbf16>
      %c0_17 = arith.constant 0 : index
      %c0_18 = arith.constant 0 : index
      %20 = vector.load %arg5[%c0_17, %c0_18] : memref<8x128xbf16, #tpu.memory_space<vmem>>, vector<8x128xbf16>
      %cst_19 = arith.constant dense<0.000000e+00> : vector<128x128xf32>
      %21 = tpu.matmul %19, %20, %cst_19 {dimension_numbers = #tpu.dot_dimension_numbers<[1], [0], [0], [1], [0, 0, 1, 1], [], []>} : vector<128x8xbf16>, vector<8x128xbf16>, vector<128x128xf32> -> vector<128x128xf32>
      %22 = arith.addf %18, %21 : vector<128x128xf32>
      %c0_20 = arith.constant 0 : index
      %c0_21 = arith.constant 0 : index
      %23 = vector.load %arg10[%c0_20, %c0_21] : memref<128x128xf32, #tpu.memory_space<vmem>>, vector<128x128xf32>
      tpu.vector_store %arg10[%c0_20, %c0_21], %22 {strides = array<i32>} : memref<128x128xf32, #tpu.memory_space<vmem>>, vector<128x128xf32>,
    } else {
    }
    %c1_i32 = arith.constant 1 : i32
    %15 = arith.cmpi eq, %arg1, %c1_i32 : i32
    %16 = arith.extui %15 : i1 to i32
    %c0_i32_12 = arith.constant 0 : i32
    %17 = arith.cmpi ne, %16, %c0_i32_12 : i32
    scf.if %17 {
      %c0_13 = arith.constant 0 : index
      %c0_14 = arith.constant 0 : index
      %18 = vector.load %arg10[%c0_13, %c0_14] : memref<128x128xf32, #tpu.memory_space<vmem>>, vector<128x128xf32>
      %c0_15 = arith.constant 0 : index
      %c0_16 = arith.constant 0 : index
      %19 = memref.load %arg7[%c0_15, %c0_16] : memref<1x1xf32, #tpu.memory_space<smem>>
      %cst_17 = arith.constant 0.000000e+00 : f32
      %20 = vector.broadcast %cst_17 : f32 to vector<128x128xf32>
      %21 = arith.cmpf oge, %18, %20 : vector<128x128xf32>
      %22 = vector.broadcast %19 : f32 to vector<128x128xf32>
      %23 = arith.mulf %22, %18 : vector<128x128xf32>
      %24 = arith.select %21, %18, %23 : vector<128x128xi1>, vector<128x128xf32>
      %c0_18 = arith.constant 0 : index
      %c0_19 = arith.constant 0 : index
      %25 = vector.load %arg8[%c0_18, %c0_19] : memref<128x128xf32, #tpu.memory_space<vmem>>, vector<128x128xf32>
      tpu.vector_store %arg8[%c0_18, %c0_19], %24 {strides = array<i32>} : memref<128x128xf32, #tpu.memory_space<vmem>>, vector<128x128xf32>,
      %cst_20 = arith.constant dense<0.000000e+00> : vector<128xf32>
      %26 = vector.multi_reduction <add>, %24, %cst_20 [0] : vector<128x128xf32> to vector<128xf32>
      %27 = vector.shape_cast %26 : vector<128xf32> to vector<1x128xf32>
      %28 = arith.mulf %24, %24 : vector<128x128xf32>
      %cst_21 = arith.constant dense<0.000000e+00> : vector<128xf32>
      %29 = vector.multi_reduction <add>, %28, %cst_21 [0] : vector<128x128xf32> to vector<128xf32>
      %30 = vector.shape_cast %29 : vector<128xf32> to vector<1x128xf32>
      %31 = tpu.concatenate %27, %30 in 0 : vector<1x128xf32>, vector<1x128xf32> -> vector<2x128xf32>
      %32 = vector.shape_cast %31 : vector<2x128xf32> to vector<1x2x128xf32>
      %c0_22 = arith.constant 0 : index
      %c0_23 = arith.constant 0 : index
      %c0_24 = arith.constant 0 : index
      %33 = vector.load %arg9[%c0_22, %c0_23, %c0_24] : memref<1x2x128xf32, #tpu.memory_space<vmem>>, vector<1x2x128xf32>
      tpu.vector_store %arg9[%c0_22, %c0_23, %c0_24], %32 {strides = array<i32>} : memref<1x2x128xf32, #tpu.memory_space<vmem>>, vector<1x2x128xf32>,
    } else {
    }
    return
  }
  func.func @transform_0(%arg0: i32, %arg1: i32) -> (i32, i32) {
    %c0_i32 = arith.constant 0 : i32
    %c0_i32_0 = arith.constant 0 : i32
    return %arg1, %c0_i32 : i32, i32
  }
  func.func @transform_1(%arg0: i32, %arg1: i32) -> (i32, i32) {
    %c0_i32 = arith.constant 0 : i32
    return %arg0, %arg1 : i32, i32
  }
  func.func @transform_2(%arg0: i32, %arg1: i32) -> (i32, i32) {
    %c0_i32 = arith.constant 0 : i32
    %c0_i32_0 = arith.constant 0 : i32
    %c0_i32_1 = arith.constant 0 : i32
    return %c0_i32, %c0_i32_0 : i32, i32
  }
  func.func @transform_3(%arg0: i32, %arg1: i32) -> (i32, i32) {
    %c0_i32 = arith.constant 0 : i32
    %c0_i32_0 = arith.constant 0 : i32
    %c0_i32_1 = arith.constant 0 : i32
    return %c0_i32, %c0_i32_0 : i32, i32
  }
  func.func @transform_4(%arg0: i32, %arg1: i32) -> (i32, i32) {
    %c0_i32 = arith.constant 0 : i32
    %c0_i32_0 = arith.constant 0 : i32
    %c0_i32_1 = arith.constant 0 : i32
    return %c0_i32, %c0_i32_0 : i32, i32
  }
  func.func @transform_5(%arg0: i32, %arg1: i32) -> (i32, i32) {
    %c0_i32 = arith.constant 0 : i32
    %c0_i32_0 = arith.constant 0 : i32
    %c0_i32_1 = arith.constant 0 : i32
    return %c0_i32, %c0_i32_0 : i32, i32
  }
  func.func @transform_6(%arg0: i32, %arg1: i32) -> (i32, i32) {
    %c0_i32 = arith.constant 0 : i32
    %c0_i32_0 = arith.constant 0 : i32
    return %arg0, %c0_i32 : i32, i32
  }
  func.func @transform_7(%arg0: i32, %arg1: i32) -> (i32, i32, i32) {
    %c0_i32 = arith.constant 0 : i32
    %c0_i32_0 = arith.constant 0 : i32
    %c0_i32_1 = arith.constant 0 : i32
    return %arg0, %c0_i32, %c0_i32_0 : i32, i32, i32
  }
}

</mosaic_0001>

<bundles_post_ra>
// kernel: gn_block.3
= control target key start
LH: loop header
LB: loop body
LE: loop exit
PB: predicated region body
PF: predicated region fallthrough
CT: control target
= control target key end

     0   :  { %s351_s12 = smov 0   ;;  %s410_s0 = inlined_call_operand.vmem [shape: f32[256,128], index: 0, kind: input, shape index: {}]   ;;  %s411_s1 = inlined_call_operand.vmem [shape: f32[1,128], index: 1, kind: input, shape index: {}]   ;;  %s412_s2 = inlined_call_operand.vmem [shape: f32[1,128], index: 2, kind: input, shape index: {}]   ;;  %s413_s3 = inlined_call_operand.vmem [shape: f32[256,128], index: 3, kind: output, shape index: {}]  }
   0x1 LB: > { %s302_s13 = sadd.s32 4294967295, %s329_s12   ;;  %p306_p0 = scmp.ge.s32.totalorder %s329_s12, 1  ;;  %s329_s12 = sphi %s351_s12, %s13_s12  }
   0x2   : > { %p138_p1 = scmp.lt.s32.totalorder %s329_s12, 3 }
   0x4   : > { %p139_p2 = pnand %p306_p0, %p138_p1 }
   0x5   : > { %s307_s14 = sshll.u32 (!%p139_p2), %s302_s13, 4 }
   0x6   : > { %142 = sbr.rel (%p139_p2) target bundleno = 35 (0x23), region = 32  ;;  %p163_p3 = scmp.lt.s32.totalorder (!%p139_p2), %s307_s14, 31 }
   0xb   : > { %s415_s14 = smov (!%p163_p3, %s307_s14), 31  ;;  %v321_v0 = vld [vmem:[%s411_s1] ss:$0 sm:$0xff] }
   0xc   : > { %s308_s17 = sshll.u32 %s415_s14, 3  ;;  %v322_v1 = vld [vmem:[%s412_s2] ss:$0 sm:$0xff] }
   0xd   : > { %s365_s20 = scalar_lea.vmem %s410_s0, %s308_s17  ;;  %s379_s25 = scalar_lea.vmem %s413_s3, %s308_s17 }
   0xe   : > { %v174_v2 = vld [vmem:[%s365_s20] sm:$0xff]  ;;  %v175_v3 = vld [vmem:[%s365_s20 + $0x8] sm:$0xff]  ;;  %v176_v4 = vld [vmem:[%s365_s20 + $0x10] sm:$0xff] }
   0xf   : > { %v194_v5 = vmul.f32 %v321_v0, %v174_v2  ;;  %v195_v6 = vmul.f32 %v321_v0, %v175_v3  ;;  %v196_v7 = vmul.f32 %v321_v0, %v176_v4  ;;  %v177_v8 = vld [vmem:[%s365_s20 + $0x18] sm:$0xff]  ;;  %v178_v9 = vld [vmem:[%s365_s20 + $0x20] sm:$0xff]  ;;  %v179_v10 = vld [vmem:[%s365_s20 + $0x28] sm:$0xff] }
  0x10   : > { %v197_v11 = vmul.f32 %v321_v0, %v177_v8  ;;  %v198_v12 = vmul.f32 %v321_v0, %v178_v9  ;;  %v199_v13 = vmul.f32 %v321_v0, %v179_v10  ;;  %v180_v14 = vld [vmem:[%s365_s20 + $0x30] sm:$0xff]  ;;  %v181_v15 = vld [vmem:[%s365_s20 + $0x38] sm:$0xff]  ;;  %v182_v16 = vld [vmem:[%s365_s20 + $0x40] sm:$0xff] }
  0x11   : > { %v214_v17 = vadd.f32 %v322_v1, %v194_v5  ;;  %v215_v18 = vadd.f32 %v322_v1, %v195_v6  ;;  %v216_v19 = vadd.f32 %v322_v1, %v196_v7  ;;  %v200_v20 = vmul.f32 %v321_v0, %v180_v14  ;;  %v183_v21 = vld [vmem:[%s365_s20 + $0x48] sm:$0xff]  ;;  %v184_v24 = vld [vmem:[%s365_s20 + $0x50] sm:$0xff]  ;;  %v185_v27 = vld [vmem:[%s365_s20 + $0x58] sm:$0xff] }
  0x12   : > { %v217_v22 = vadd.f32 %v322_v1, %v197_v11  ;;  %v201_v23 = vmul.f32 %v321_v0, %v181_v15  ;;  %v218_v25 = vadd.f32 %v322_v1, %v198_v12  ;;  %v202_v26 = vmul.f32 %v321_v0, %v182_v16  ;;  %v186_v30 = vld [vmem:[%s365_s20 + $0x60] sm:$0xff]  ;;  %v187_v33 = vld [vmem:[%s365_s20 + $0x68] sm:$0xff]  ;;  %v188_v36 = vld [vmem:[%s365_s20 + $0x70] sm:$0xff] }
  0x13   : > { %230 = vst [vmem:[%s379_s25] sm:$0xff] %v214_v17  ;;  %v219_v28 = vadd.f32 %v322_v1, %v199_v13  ;;  %v203_v29 = vmul.f32 %v321_v0, %v183_v21  ;;  %v220_v31 = vadd.f32 %v322_v1, %v200_v20  ;;  %v204_v32 = vmul.f32 %v321_v0, %v184_v24  ;;  %v189_v39 = vld [vmem:[%s365_s20 + $0x78] sm:$0xff] }
  0x14   : > { %231 = vst [vmem:[%s379_s25 + $0x8] sm:$0xff] %v215_v18  ;;  %v221_v34 = vadd.f32 %v322_v1, %v201_v23  ;;  %v205_v35 = vmul.f32 %v321_v0, %v185_v27  ;;  %v222_v37 = vadd.f32 %v322_v1, %v202_v26  ;;  %v206_v38 = vmul.f32 %v321_v0, %v186_v30 }
  0x15   : > { %232 = vst [vmem:[%s379_s25 + $0x10] sm:$0xff] %v216_v19  ;;  %v223_v40 = vadd.f32 %v322_v1, %v203_v29  ;;  %v207_v41 = vmul.f32 %v321_v0, %v187_v33  ;;  %v224_v42 = vadd.f32 %v322_v1, %v204_v32  ;;  %v208_v43 = vmul.f32 %v321_v0, %v188_v36 }
  0x16   : > { %233 = vst [vmem:[%s379_s25 + $0x18] sm:$0xff] %v217_v22  ;;  %v225_v44 = vadd.f32 %v322_v1, %v205_v35  ;;  %v209_v45 = vmul.f32 %v321_v0, %v189_v39  ;;  %v226_v46 = vadd.f32 %v322_v1, %v206_v38 }
  0x17   : > { %234 = vst [vmem:[%s379_s25 + $0x20] sm:$0xff] %v218_v25  ;;  %v227_v47 = vadd.f32 %v322_v1, %v207_v41  ;;  %v228_v48 = vadd.f32 %v322_v1, %v208_v43 }
  0x18   : > { %235 = vst [vmem:[%s379_s25 + $0x28] sm:$0xff] %v219_v28  ;;  %v229_v49 = vadd.f32 %v322_v1, %v209_v45 }
  0x19   : > { %236 = vst [vmem:[%s379_s25 + $0x30] sm:$0xff] %v220_v31 }
  0x1a   : > { %237 = vst [vmem:[%s379_s25 + $0x38] sm:$0xff] %v221_v34 }
  0x1b   : > { %238 = vst [vmem:[%s379_s25 + $0x40] sm:$0xff] %v222_v37 }
  0x1c   : > { %239 = vst [vmem:[%s379_s25 + $0x48] sm:$0xff] %v223_v40 }
  0x1d   : > { %240 = vst [vmem:[%s379_s25 + $0x50] sm:$0xff] %v224_v42 }
  0x1e   : > { %241 = vst [vmem:[%s379_s25 + $0x58] sm:$0xff] %v225_v44 }
  0x1f   : > { %242 = vst [vmem:[%s379_s25 + $0x60] sm:$0xff] %v226_v46 }
  0x20   : > { %243 = vst [vmem:[%s379_s25 + $0x68] sm:$0xff] %v227_v47 }
  0x21   : > { %244 = vst [vmem:[%s379_s25 + $0x70] sm:$0xff] %v228_v48 }
  0x22   : > { %245 = vst [vmem:[%s379_s25 + $0x78] sm:$0xff] %v229_v49 }
  0x23 PF: > { %s13_s12 = sadd.s32 1, %s329_s12  }
  0x24   : > { %p10_p4 = scmp.ge.s32.totalorder %s13_s12, 4  }
  0x26   :  { %12 = sbr.rel (!%p10_p4) target bundleno = 1 (0x1), region = 62 }

// kernel: gn_block.2
= control target key start
LH: loop header
LB: loop body
LE: loop exit
PB: predicated region body
PF: predicated region fallthrough
CT: control target
= control target key end

     0   :  { %s1768_s0 = inlined_call_operand.vmem [shape: bf16[256,8], index: 0, kind: input, shape index: {}]   ;;  %s1769_s1 = inlined_call_operand.vmem [shape: bf16[256,256], index: 1, kind: input, shape index: {}]   ;;  %s1770_s2 = inlined_call_operand.vmem [shape: bf16[8,128], index: 2, kind: input, shape index: {}]   ;;  %s1771_s3 = inlined_call_operand.vmem [shape: bf16[8,128], index: 3, kind: input, shape index: {}]   ;;  %s1772_s4 = inlined_call_operand.vmem [shape: f32[1,128], index: 4, kind: input, shape index: {}]   ;;  %s1773_s5 = inlined_call_operand.<no memory space> [shape: f32[1,1], index: 5, kind: input, shape index: {}]   ;;  %s1774_s6 = inlined_call_operand.vmem [shape: f32[256,128], index: 6, kind: output, shape index: {0}]   ;;  %s1775_s7 = inlined_call_operand.vmem [shape: f32[2,2,128], index: 7, kind: output, shape index: {1}]  }
   0x1   :  { %1776 = sst [smem:[#allocation5_spill]] %s1769_s1 }
   0x2   :  { %13 = sst [smem:[#allocation3]] %s1773_s5 }
   0x3   :  { %s1540_s26 = smov 0   ;;  %s1542_s27 = smov 0  }
   0x4   :  { %s1544_s28 = smov 0   ;;  %s1546_s29 = smov 0  }
   0x5   :  { %s1548_s30 = smov 0   ;;  %s1550_s8 = smov 0  }
   0x6   :  { %s1552_s9 = smov 0  }
   0x7 LB: > { %s28_s5 = sadd.s32 1, %s1487_s30  ;;  %s31_s10 = sadd.s32 1, %s1491_s8  ;;  %s1495_s9 = sphi %s1552_s9, %s19_s9   ;;  %s1491_s8 = sphi %s1550_s8, %s1783_s8   ;;  %s1487_s30 = sphi %s1548_s30, %s1782_s30   ;;  %s1483_s29 = sphi %s1546_s29, %s1781_s29   ;;  %s1479_s28 = sphi %s1544_s28, %s1780_s28   ;;  %s1475_s27 = sphi %s1542_s27, %s1779_s27   ;;  %s1471_s26 = sphi %s1540_s26, %s1778_s26  }
   0x8   : > { %p29_p0 = scmp.ge.s32.totalorder %s28_s5, 2  ;;  %p73_p1 = scmp.ne.s32.totalorder %s1475_s27, %s1471_s26 }
   0x9   : > { %p74_p2 = scmp.eq.s32.totalorder %s1495_s9, 0  ;;  %s66_s14 = sadd.s32 1, %s1475_s27 }
   0xa   : > { %s1785_s5 = smov (%p29_p0, %s28_s5), 0  ;;  %s1787_s10 = smov (!%p29_p0, %s31_s10), %s1491_s8 }
   0xb   : > { %p75_p3 = por %p74_p2, %p73_p1  ;;  %p33_p4 = scmp.ge.s32.totalorder %s1787_s10, 2 }
   0xc   : > { %s62_s11 = ssub.s32 %s1487_s30, %s1785_s5  ;;  %p1218_p6 = scmp.ge.s32.totalorder %s1495_s9, 4 }
   0xd   : > { %s1789_s10 = smov (%p33_p4, %s1787_s10), 0 }
   0xe   : > { %s61_s12 = ssub.s32 %s1491_s8, %s1789_s10  ;;  %247 = sbr.rel (%p1218_p6) target bundleno = 45 (0x2d), region = 32 }
   0xf   : > { %s63_s13 = sor.u32 %s62_s11, %s61_s12 }
  0x10   : > { %p64_p5 = scmp.eq.s32.totalorder %s63_s13, 0 }
  0x12   : > { %s1591_s15 = scalar_select %p64_p5, %s1475_s27, %s66_s14  }
  0x13   : > { %259 = sbr.rel (!%p75_p3) target bundleno = 45 (0x2d), region = 40  ;;  %s261_s16 = sand.u32 (%p75_p3), 1, %s1475_s27  }
  0x14   : > { %s1347_s17 = sshll.u32 (%p75_p3), %s1491_s8, 5  ;;  %s1219_s18 = sshll.u32 (%p75_p3), %s261_s16, 6 }
  0x15   : > { %s266_s19 = sadd.s32 (%p75_p3), %s1487_s30, %s1347_s17  ;;  %s1777_s1 = sld [smem:[#allocation5_spill]] (%p75_p3) }
  0x16   : > { %s1222_s20 = sshll.u32 (%p75_p3), %s266_s19, 2  ;;  %s263_s24 = scalar_lea.vmem (%p75_p3), [#allocation4], %s1219_s18 }
  0x1b   : > { %s1600_s23 = scalar_lea.vmem %s1777_s1, %s1222_s20 }
  0x1c   : > { %v285_v0 = vld [vmem:[%s1600_s23] sm:$0xf]  ;;  %v287_v1 = vld [vmem:[%s1600_s23 + $0x8] sm:$0xf]  ;;  %v289_v2 = vld [vmem:[%s1600_s23 + $0x10] sm:$0xf] }
  0x1d   : > { %286 = vst [vmem:[%s263_s24] sm:$0xf] %v285_v0  ;;  %v291_v3 = vld [vmem:[%s1600_s23 + $0x18] sm:$0xf]  ;;  %v293_v4 = vld [vmem:[%s1600_s23 + $0x20] sm:$0xf] }
  0x1e   : > { %288 = vst [vmem:[%s263_s24 + $0x4] sm:$0xf] %v287_v1  ;;  %v295_v5 = vld [vmem:[%s1600_s23 + $0x28] sm:$0xf]  ;;  %v297_v6 = vld [vmem:[%s1600_s23 + $0x30] sm:$0xf] }
  0x1f   : > { %290 = vst [vmem:[%s263_s24 + $0x8] sm:$0xf] %v289_v2  ;;  %v299_v7 = vld [vmem:[%s1600_s23 + $0x38] sm:$0xf]  ;;  %v301_v8 = vld [vmem:[%s1600_s23 + $0x40] sm:$0xf] }
  0x20   : > { %292 = vst [vmem:[%s263_s24 + $0xc] sm:$0xf] %v291_v3  ;;  %v303_v9 = vld [vmem:[%s1600_s23 + $0x48] sm:$0xf]  ;;  %v305_v10 = vld [vmem:[%s1600_s23 + $0x50] sm:$0xf] }
  0x21   : > { %294 = vst [vmem:[%s263_s24 + $0x10] sm:$0xf] %v293_v4  ;;  %v307_v11 = vld [vmem:[%s1600_s23 + $0x58] sm:$0xf]  ;;  %v309_v12 = vld [vmem:[%s1600_s23 + $0x60] sm:$0xf] }
  0x22   : > { %296 = vst [vmem:[%s263_s24 + $0x14] sm:$0xf] %v295_v5  ;;  %v311_v13 = vld [vmem:[%s1600_s23 + $0x68] sm:$0xf]  ;;  %v313_v14 = vld [vmem:[%s1600_s23 + $0x70] sm:$0xf] }
  0x23   : > { %298 = vst [vmem:[%s263_s24 + $0x18] sm:$0xf] %v297_v6  ;;  %v315_v15 = vld [vmem:[%s1600_s23 + $0x78] sm:$0xf] }
  0x24   : > { %300 = vst [vmem:[%s263_s24 + $0x1c] sm:$0xf] %v299_v7 }
  0x25   : > { %302 = vst [vmem:[%s263_s24 + $0x20] sm:$0xf] %v301_v8 }
  0x26   : > { %304 = vst [vmem:[%s263_s24 + $0x24] sm:$0xf] %v303_v9 }
  0x27   : > { %306 = vst [vmem:[%s263_s24 + $0x28] sm:$0xf] %v305_v10 }
  0x28   : > { %308 = vst [vmem:[%s263_s24 + $0x2c] sm:$0xf] %v307_v11 }
  0x29   : > { %310 = vst [vmem:[%s263_s24 + $0x30] sm:$0xf] %v309_v12 }
  0x2a   : > { %312 = vst [vmem:[%s263_s24 + $0x34] sm:$0xf] %v311_v13 }
  0x2b   : > { %314 = vst [vmem:[%s263_s24 + $0x38] sm:$0xf] %v313_v14 }
  0x2c   : > { %316 = vst [vmem:[%s263_s24 + $0x3c] sm:$0xf] %v315_v15 }
  0x2d PF: > { %p1223_p7 = scmp.ge.s32.totalorder %s1495_s9, 1  ;;  %p371_p8 = scmp.lt.s32.totalorder %s1495_s9, 5 }
  0x2f   : > { %p372_p9 = pnand %p1223_p7, %p371_p8 }
  0x30   : > { %s378_s25 = sand.u32 (!%p372_p9), 1, %s1471_s26   ;;  %s1225_s11 = sshll.u32 (!%p372_p9), %s1479_s28, 4 }
  0x31   : > { %375 = sbr.rel (%p372_p9) target bundleno = 720 (0x2d0), region = 81  ;;  %s1224_s12 = sshll.u32 (!%p372_p9), %s378_s25, 6 }
  0x32   : > { %p419_p10 = scmp.lt.s32.totalorder (!%p372_p9), %s1225_s11, 31  ;;  %s1227_s13 = sshll.u32 (!%p372_p9), %s1483_s29, 4 }
  0x33   : > { %p426_p11 = scmp.lt.s32.totalorder (!%p372_p9), %s1227_s13, 31  ;;  %p431_p12 = scmp.lt.s32.totalorder (!%p372_p9), %s1483_s29, 1 }
  0x34   : > { %p1230_p13 = scmp.ne.s32.totalorder (!%p372_p9), %s1479_s28, 0 }
  0x36   : > { %s1791_s11 = smov (!%p419_p10, %s1225_s11), 31  ;;  %s1793_s13 = smov (!%p426_p11, %s1227_s13), 31 }
  0x37   : > { %s1226_s14 = sshll.u32 %s1791_s11, 2  ;;  %s1228_s20 = sshll.u32 %s1793_s13, 3 }
  0x38   : > { %s1627_s18 = scalar_lea.vmem %s1768_s0, %s1226_s14  ;;  %s1633_s26 = scalar_lea.vmem %s1774_s6, %s1228_s20 }
  0x39   : > { %s432_s19 = scalar_select %p431_p12, %s1483_s29, 1 }
  0x3a   : > { %s1640_s11 = scalar_lea.vmem [#allocation4], %s1224_s12  ;;  %439 = sbr.rel (%p1230_p13) target bundleno = 80 (0x50), region = 89 }
  0x3b   : > { %s1229_s23 = sshll.u32 %s432_s19, 1 }
  0x3c   : > { %s1638_s1 = scalar_lea.vmem %s1775_s7, %s1229_s23 }
  0x3f   : > { %v1440_v16 = vld [vmem:[%s1772_s4] ss:$0 sm:$0xff] }
  0x40   : > { %444 = vst [vmem:[#allocation2 + $0x30] sm:$0xff] %v1440_v16 }
  0x41   : > { %445 = vst [vmem:[#allocation2] sm:$0xff] %v1440_v16 }
  0x42   : > { %446 = vst [vmem:[#allocation2 + $0x58] sm:$0xff] %v1440_v16 }
  0x43   : > { %447 = vst [vmem:[#allocation2 + $0x18] sm:$0xff] %v1440_v16 }
  0x44   : > { %448 = vst [vmem:[#allocation2 + $0x50] sm:$0xff] %v1440_v16 }
  0x45   : > { %449 = vst [vmem:[#allocation2 + $0x68] sm:$0xff] %v1440_v16 }
  0x46   : > { %450 = vst [vmem:[#allocation2 + $0x8] sm:$0xff] %v1440_v16 }
  0x47   : > { %451 = vst [vmem:[#allocation2 + $0x48] sm:$0xff] %v1440_v16 }
  0x48   : > { %452 = vst [vmem:[#allocation2 + $0x40] sm:$0xff] %v1440_v16 }
  0x49   : > { %453 = vst [vmem:[#allocation2 + $0x20] sm:$0xff] %v1440_v16 }
  0x4a   : > { %454 = vst [vmem:[#allocation2 + $0x10] sm:$0xff] %v1440_v16 }
  0x4b   : > { %455 = vst [vmem:[#allocation2 + $0x38] sm:$0xff] %v1440_v16 }
  0x4c   : > { %456 = vst [vmem:[#allocation2 + $0x60] sm:$0xff] %v1440_v16 }
  0x4d   : > { %457 = vst [vmem:[#allocation2 + $0x70] sm:$0xff] %v1440_v16 }
  0x4e   : > { %458 = vst [vmem:[#allocation2 + $0x78] sm:$0xff] %v1440_v16 }
  0x4f   : > { %459 = vst [vmem:[#allocation2 + $0x28] sm:$0xff] %v1440_v16 }
  0x50 PF: > { %v476_v17 = vld [vmem:[%s1770_s2] sm:$0xf]  ;;  %vm542_vm0 = vcmask 1043456   ;;  %v1353_v20 = vld [vmem:[%s1627_s18 + $0x28] sm:$0xff]  ;;  %vm517_vm1 = vcmask 64512   ;;  %v1354_v22 = vld [vmem:[%s1627_s18 + $0x30] sm:$0xff]  ;;  %p1303_p0 = scmp.ne.s32.totalorder %s1479_s28, %s1483_s29 }
  0x51   : > { %v544_v18 = vsel %vm542_vm0, %v476_v17, 0  ;;  %v1348_v19 = vld [vmem:[%s1627_s18] sm:$0xff]  ;;  %v1349_v21 = vld [vmem:[%s1627_s18 + $0x8] sm:$0xff]  ;;  %v1350_v23 = vld [vmem:[%s1627_s18 + $0x10] sm:$0xff] }
  0x52   : > { %553 = vmatpush.bf16.msra.mxu0 %v544_v18  ;;  %1372 = vmatpush.bf16.msra.mxu3 %v544_v18  ;;  %v1355_v24 = vld [vmem:[%s1627_s18 + $0x38] sm:$0xff]  ;;  %v1352_v26 = vld [vmem:[%s1627_s18 + $0x20] sm:$0xff]  ;;  %v1357_v53 = vld [vmem:[%s1640_s11 + $0x8] sm:$0xff] }
  0x53   : > { %v1351_v25 = vld [vmem:[%s1627_s18 + $0x18] sm:$0xff]  ;;  %v1356_v51 = vld [vmem:[%s1640_s11] sm:$0xff]  ;;  %v1361_v54 = vld [vmem:[%s1640_s11 + $0x28] sm:$0xff] }
  0x54   : > { %v1360_v52 = vld [vmem:[%s1640_s11 + $0x20] sm:$0xff]  ;;  %v1358_v55 = vld [vmem:[%s1640_s11 + $0x10] sm:$0xff]  ;;  %v1359_v57 = vld [vmem:[%s1640_s11 + $0x18] sm:$0xff] }
  0x55   : > { %1263 = vmatmul.msk.bf16.vlgmr.msra.gmra.mxu0 %vm517_vm1, %v1348_v19  ;;  %1268 = vmatmul.msk.bf16.vlgmr.msra.gmra.mxu3 %vm517_vm1, %v1353_v20  ;;  %v1362_v56 = vld [vmem:[%s1640_s11 + $0x30] sm:$0xff]  ;;  %v1363_v58 = vld [vmem:[%s1640_s11 + $0x38] sm:$0xff]  ;;  %v611_v62 = vld [vmem:[#allocation2 + $0x40] sm:$0xff] }
  0x56   : > { %v603_v59 = vld [vmem:[#allocation2 + $0x30] sm:$0xff]  ;;  %v604_v0 = vld [vmem:[#allocation2] sm:$0xff]  ;;  %v605_v6 = vld [vmem:[#allocation2 + $0x58] sm:$0xff] }
  0x57   : > { %v612_v4 = vld [vmem:[#allocation2 + $0x20] sm:$0xff]  ;;  %v613_v10 = vld [vmem:[#allocation2 + $0x10] sm:$0xff]  ;;  %v606_v12 = vld [vmem:[#allocation2 + $0x18] sm:$0xff] }
  0x58   : > { %v614_v16 = vld [vmem:[#allocation2 + $0x38] sm:$0xff]  ;;  %v607_v18 = vld [vmem:[#allocation2 + $0x50] sm:$0xff] }
  0x65   : > { %1264 = vmatmul.msk.bf16.gmra.mxu0 %vm517_vm1, %v1349_v21  ;;  %1269 = vmatmul.msk.bf16.gmra.mxu3 %vm517_vm1, %v1354_v22  ;;  %v615_v22 = vld [vmem:[#allocation2 + $0x60] sm:$0xff] }
  0x75   : > { %1265 = vmatmul.msk.bf16.gmra.mxu0 %vm517_vm1, %v1350_v23  ;;  %1270 = vmatmul.msk.bf16.gmra.mxu3 %vm517_vm1, %v1355_v24  ;;  %v608_v24 = vld [vmem:[#allocation2 + $0x68] sm:$0xff] }
  0x85   : > { %1266 = vmatmul.msk.bf16.gmra.mxu0 %vm517_vm1, %v1351_v25 }
  0x95   : > { %1267 = vmatmul.msk.bf16.gmra.mxu0 %vm517_vm1, %v1352_v26 }
  0xd2   : > { %v555_v27 = vpop.f32.mrf.mxu0 }
  0xd8   : > { %v580_v28 = vpop.f32.mrf.mxu3 }
  0xda   : > { %v557_v29 = vpop.f32.mrf.mxu0 }
  0xdb   : > { %v595_v30 = vpack.c.bf16 %v557_v29, %v555_v27 }
  0xe0   : > { %v582_v31 = vpop.f32.mrf.mxu3 }
  0xe1   : > { %v600_v43 = vpack.c.bf16 %v582_v31, %v580_v28  ;;  %v616_v28 = vld [vmem:[#allocation2 + $0x70] sm:$0xff] }
  0xe2   : > { %v560_v32 = vpop.f32.mrf.mxu0 }
  0xe8   : > { %v585_v33 = vpop.f32.mrf.mxu3 }
  0xea   : > { %v562_v34 = vpop.f32.mrf.mxu0 }
  0xeb   : > { %v596_v50 = vpack.c.bf16 %v562_v34, %v560_v32  ;;  %v617_v34 = vld [vmem:[#allocation2 + $0x78] sm:$0xff] }
  0xf0   : > { %v587_v35 = vpop.f32.mrf.mxu3 }
  0xf1   : > { %v601_v42 = vpack.c.bf16 %v587_v35, %v585_v33 }
  0xf2   : > { %v565_v36 = vpop.f32.mrf.mxu0 }
  0xf8   : > { %v590_v37 = vpop.f32.mrf.mxu3 }
  0xfa   : > { %v567_v38 = vpop.f32.mrf.mxu0 }
  0xfb   : > { %v597_v49 = vpack.c.bf16 %v567_v38, %v565_v36  ;;  %v610_v36 = vld [vmem:[#allocation2 + $0x48] sm:$0xff] }
 0x100   : > { %v592_v39 = vpop.f32.mrf.mxu3 }
 0x101   : > { %v602_v40 = vpack.c.bf16 %v592_v39, %v590_v37 }
 0x102   : > { %v570_v41 = vpop.f32.mrf.mxu0 }
 0x103   : > { %683 = vmatpush.bf16.msra.mxu1 %v602_v40  ;;  %1373 = vmatpush.bf16.msra.mxu2 %v602_v40  ;;  %v618_v40 = vld [vmem:[#allocation2 + $0x28] sm:$0xff] }
 0x107   : > { %684 = vmatpush.bf16.msra.mxu1 %v601_v42  ;;  %1374 = vmatpush.bf16.msra.mxu2 %v601_v42 }
 0x10a   : > { %v572_v44 = vpop.f32.mrf.mxu0 }
 0x10b   : > { %685 = vmatpush.bf16.msra.mxu1 %v600_v43  ;;  %1375 = vmatpush.bf16.msra.mxu2 %v600_v43  ;;  %v598_v48 = vpack.c.bf16 %v572_v44, %v570_v41 }
 0x112   : > { %v575_v45 = vpop.f32.mrf.mxu0 }
 0x11a   : > { %v577_v46 = vpop.f32.mrf.mxu0 }
 0x11b   : > { %v599_v47 = vpack.c.bf16 %v577_v46, %v575_v45 }
 0x11d   : > { %686 = vmatpush.bf16.msra.mxu1 %v599_v47  ;;  %1376 = vmatpush.bf16.msra.mxu2 %v599_v47 }
 0x121   : > { %687 = vmatpush.bf16.msra.mxu1 %v598_v48  ;;  %1377 = vmatpush.bf16.msra.mxu2 %v598_v48 }
 0x125   : > { %688 = vmatpush.bf16.msra.mxu1 %v597_v49  ;;  %1378 = vmatpush.bf16.msra.mxu2 %v597_v49 }
 0x129   : > { %689 = vmatpush.bf16.msra.mxu1 %v596_v50  ;;  %1379 = vmatpush.bf16.msra.mxu2 %v596_v50 }
 0x12d   : > { %690 = vmatpush.bf16.msra.mxu1 %v595_v30  ;;  %1380 = vmatpush.bf16.msra.mxu2 %v595_v30  ;;  %v609_v30 = vld [vmem:[#allocation2 + $0x8] sm:$0xff] }
 0x130   : > { %691 = vmatmul.bf16.vlgmr.msra.gmra.mxu1 %v1356_v51  ;;  %711 = vmatmul.bf16.vlgmr.msra.gmra.mxu2 %v1360_v52 }
 0x140   : > { %696 = vmatmul.bf16.gmra.mxu1 %v1357_v53  ;;  %716 = vmatmul.bf16.gmra.mxu2 %v1361_v54 }
 0x150   : > { %701 = vmatmul.bf16.gmra.mxu1 %v1358_v55  ;;  %721 = vmatmul.bf16.gmra.mxu2 %v1362_v56 }
 0x160   : > { %706 = vmatmul.bf16.gmra.mxu1 %v1359_v57  ;;  %726 = vmatmul.bf16.gmra.mxu2 %v1363_v58 }
 0x1ad   : > { %v692_v60 = vpop.f32.mrf.mxu1 }
 0x1ae   : > { %v732_v61 = vadd.f32 %v692_v60, %v603_v59 }
 0x1b0   : > { %748 = vst [vmem:[#allocation2 + $0x30] sm:$0xff] %v732_v61 }
 0x1b3   : > { %v712_v63 = vpop.f32.mrf.mxu2 }
 0x1b4   : > { %v740_v1 = vadd.f32 %v712_v63, %v611_v62 }
 0x1b5   : > { %v694_v2 = vpop.f32.mrf.mxu1 }
 0x1b6   : > { %756 = vst [vmem:[#allocation2 + $0x40] sm:$0xff] %v740_v1  ;;  %v733_v3 = vadd.f32 %v694_v2, %v604_v0 }
 0x1b8   : > { %749 = vst [vmem:[#allocation2] sm:$0xff] %v733_v3 }
 0x1bb   : > { %v714_v5 = vpop.f32.mrf.mxu2 }
 0x1bc   : > { %v741_v7 = vadd.f32 %v714_v5, %v612_v4 }
 0x1bd   : > { %v697_v8 = vpop.f32.mrf.mxu1 }
 0x1be   : > { %757 = vst [vmem:[#allocation2 + $0x20] sm:$0xff] %v741_v7  ;;  %v734_v9 = vadd.f32 %v697_v8, %v605_v6 }
 0x1c0   : > { %750 = vst [vmem:[#allocation2 + $0x58] sm:$0xff] %v734_v9 }
 0x1c3   : > { %v717_v11 = vpop.f32.mrf.mxu2 }
 0x1c4   : > { %v742_v13 = vadd.f32 %v717_v11, %v613_v10 }
 0x1c5   : > { %v699_v14 = vpop.f32.mrf.mxu1 }
 0x1c6   : > { %758 = vst [vmem:[#allocation2 + $0x10] sm:$0xff] %v742_v13  ;;  %v735_v15 = vadd.f32 %v699_v14, %v606_v12 }
 0x1c8   : > { %751 = vst [vmem:[#allocation2 + $0x18] sm:$0xff] %v735_v15 }
 0x1cb   : > { %v719_v17 = vpop.f32.mrf.mxu2 }
 0x1cc   : > { %v743_v19 = vadd.f32 %v719_v17, %v614_v16 }
 0x1cd   : > { %v702_v20 = vpop.f32.mrf.mxu1 }
 0x1ce   : > { %759 = vst [vmem:[#allocation2 + $0x38] sm:$0xff] %v743_v19  ;;  %v736_v21 = vadd.f32 %v702_v20, %v607_v18 }
 0x1d0   : > { %752 = vst [vmem:[#allocation2 + $0x50] sm:$0xff] %v736_v21 }
 0x1d3   : > { %v722_v23 = vpop.f32.mrf.mxu2 }
 0x1d4   : > { %v744_v25 = vadd.f32 %v722_v23, %v615_v22 }
 0x1d5   : > { %v704_v26 = vpop.f32.mrf.mxu1 }
 0x1d6   : > { %760 = vst [vmem:[#allocation2 + $0x60] sm:$0xff] %v744_v25  ;;  %v737_v27 = vadd.f32 %v704_v26, %v608_v24 }
 0x1d8   : > { %753 = vst [vmem:[#allocation2 + $0x68] sm:$0xff] %v737_v27 }
 0x1db   : > { %v724_v29 = vpop.f32.mrf.mxu2 }
 0x1dc   : > { %v745_v31 = vadd.f32 %v724_v29, %v616_v28 }
 0x1dd   : > { %v707_v32 = vpop.f32.mrf.mxu1 }
 0x1de   : > { %761 = vst [vmem:[#allocation2 + $0x70] sm:$0xff] %v745_v31  ;;  %v738_v33 = vadd.f32 %v707_v32, %v609_v30 }
 0x1e0   : > { %754 = vst [vmem:[#allocation2 + $0x8] sm:$0xff] %v738_v33 }
 0x1e3   : > { %v727_v35 = vpop.f32.mrf.mxu2 }
 0x1e4   : > { %v746_v37 = vadd.f32 %v727_v35, %v617_v34 }
 0x1e5   : > { %v709_v38 = vpop.f32.mrf.mxu1 }
 0x1e6   : > { %762 = vst [vmem:[#allocation2 + $0x78] sm:$0xff] %v746_v37  ;;  %v739_v39 = vadd.f32 %v709_v38, %v610_v36 }
 0x1e8   : > { %755 = vst [vmem:[#allocation2 + $0x48] sm:$0xff] %v739_v39 }
 0x1ea   : > { %767 = sbr.rel (%p1303_p0) target bundleno = 661 (0x295), region = 93 }
 0x1eb   : > { %v729_v41 = vpop.f32.mrf.mxu2 }
 0x1ec   : > { %v747_v42 = vadd.f32 %v729_v41, %v618_v40 }
 0x1ee   : > { %763 = vst [vmem:[#allocation2 + $0x28] sm:$0xff] %v747_v42 }
 0x1ef   : > { %v800_v43 = vld [vmem:[%s1771_s3] sm:$0xf]  ;;  %v1366_v46 = vld [vmem:[%s1627_s18 + $0x10] sm:$0xff]  ;;  %v1365_v49 = vld [vmem:[%s1627_s18 + $0x8] sm:$0xff] }
 0x1f0   : > { %v866_v44 = vsel %vm542_vm0, %v800_v43, 0  ;;  %v1364_v45 = vld [vmem:[%s1627_s18] sm:$0xff]  ;;  %v1370_v48 = vld [vmem:[%s1627_s18 + $0x30] sm:$0xff]  ;;  %v1367_v50 = vld [vmem:[%s1627_s18 + $0x18] sm:$0xff] }
 0x1f1   : > { %875 = vmatpush.bf16.msra.mxu0 %v866_v44  ;;  %1381 = vmatpush.bf16.msra.mxu1 %v866_v44  ;;  %v1368_v47 = vld [vmem:[%s1627_s18 + $0x20] sm:$0xff]  ;;  %v1369_v51 = vld [vmem:[%s1627_s18 + $0x28] sm:$0xff]  ;;  %v1371_v52 = vld [vmem:[%s1627_s18 + $0x38] sm:$0xff] }
 0x1f2   : > { %1382 = vmatpush.bf16.msra.mxu2 %v866_v44  ;;  %1383 = vmatpush.bf16.msra.mxu3 %v866_v44  ;;  %v768_v53 = vld [vmem:[#allocation2 + $0x30] sm:$0xff]  ;;  %v776_v59 = vld [vmem:[#allocation2 + $0x40] sm:$0xff]  ;;  %v773_v62 = vld [vmem:[#allocation2 + $0x68] sm:$0xff] }
 0x1f3   : > { %v772_v54 = vld [vmem:[#allocation2 + $0x50] sm:$0xff]  ;;  %v780_v60 = vld [vmem:[#allocation2 + $0x60] sm:$0xff]  ;;  %v770_v9 = vld [vmem:[#allocation2 + $0x58] sm:$0xff] }
 0x1f4   : > { %1336 = vmatmul.msk.bf16.vlgmr.msra.gmra.mxu0 %vm517_vm1, %v1364_v45  ;;  %1338 = vmatmul.msk.bf16.vlgmr.msra.gmra.mxu1 %vm517_vm1, %v1366_v46  ;;  %v769_v61 = vld [vmem:[#allocation2] sm:$0xff]  ;;  %v781_v8 = vld [vmem:[#allocation2 + $0x70] sm:$0xff]  ;;  %v774_v10 = vld [vmem:[#allocation2 + $0x8] sm:$0xff] }
 0x1f5   : > { %1340 = vmatmul.msk.bf16.vlgmr.msra.gmra.mxu2 %vm517_vm1, %v1368_v47  ;;  %1342 = vmatmul.msk.bf16.vlgmr.msra.gmra.mxu3 %vm517_vm1, %v1370_v48  ;;  %v777_v7 = vld [vmem:[#allocation2 + $0x20] sm:$0xff]  ;;  %v778_v19 = vld [vmem:[#allocation2 + $0x10] sm:$0xff]  ;;  %v782_v20 = vld [vmem:[#allocation2 + $0x78] sm:$0xff] }
 0x1f6   : > { %v771_v21 = vld [vmem:[#allocation2 + $0x18] sm:$0xff]  ;;  %v775_v22 = vld [vmem:[#allocation2 + $0x48] sm:$0xff] }
 0x1f7   : > { %v779_v31 = vld [vmem:[#allocation2 + $0x38] sm:$0xff]  ;;  %v783_v32 = vld [vmem:[#allocation2 + $0x28] sm:$0xff] }
 0x204   : > { %1337 = vmatmul.msk.bf16.gmra.mxu0 %vm517_vm1, %v1365_v49  ;;  %1339 = vmatmul.msk.bf16.gmra.mxu1 %vm517_vm1, %v1367_v50 }
 0x205   : > { %1341 = vmatmul.msk.bf16.gmra.mxu2 %vm517_vm1, %v1369_v51  ;;  %1343 = vmatmul.msk.bf16.gmra.mxu3 %vm517_vm1, %v1371_v52 }
 0x271   : > { %v877_v55 = vpop.f32.mrf.mxu0  ;;  %v887_v56 = vpop.f32.mrf.mxu1 }
 0x272   : > { %v917_v57 = vadd.f32 %v877_v55, %v768_v53  ;;  %v921_v58 = vadd.f32 %v887_v56, %v772_v54 }
 0x274   : > { %933 = vst [vmem:[#allocation2 + $0x30] sm:$0xff] %v917_v57 }
 0x275   : > { %937 = vst [vmem:[#allocation2 + $0x50] sm:$0xff] %v921_v58 }
 0x278   : > { %v897_v63 = vpop.f32.mrf.mxu2  ;;  %v907_v0 = vpop.f32.mrf.mxu3 }
 0x279   : > { %v925_v1 = vadd.f32 %v897_v63, %v776_v59  ;;  %v929_v2 = vadd.f32 %v907_v0, %v780_v60  ;;  %v879_v3 = vpop.f32.mrf.mxu0  ;;  %v889_v4 = vpop.f32.mrf.mxu1 }
 0x27a   : > { %v918_v5 = vadd.f32 %v879_v3, %v769_v61  ;;  %v922_v6 = vadd.f32 %v889_v4, %v773_v62 }
 0x27b   : > { %941 = vst [vmem:[#allocation2 + $0x40] sm:$0xff] %v925_v1 }
 0x27c   : > { %945 = vst [vmem:[#allocation2 + $0x60] sm:$0xff] %v929_v2 }
 0x27d   : > { %934 = vst [vmem:[#allocation2] sm:$0xff] %v918_v5 }
 0x27e   : > { %938 = vst [vmem:[#allocation2 + $0x68] sm:$0xff] %v922_v6 }
 0x280   : > { %v899_v11 = vpop.f32.mrf.mxu2  ;;  %v909_v12 = vpop.f32.mrf.mxu3 }
 0x281   : > { %v926_v13 = vadd.f32 %v899_v11, %v777_v7  ;;  %v930_v14 = vadd.f32 %v909_v12, %v781_v8  ;;  %v882_v15 = vpop.f32.mrf.mxu0  ;;  %v892_v16 = vpop.f32.mrf.mxu1 }
 0x282   : > { %v919_v17 = vadd.f32 %v882_v15, %v770_v9  ;;  %v923_v18 = vadd.f32 %v892_v16, %v774_v10 }
 0x283   : > { %942 = vst [vmem:[#allocation2 + $0x20] sm:$0xff] %v926_v13 }
 0x284   : > { %946 = vst [vmem:[#allocation2 + $0x70] sm:$0xff] %v930_v14 }
 0x285   : > { %935 = vst [vmem:[#allocation2 + $0x58] sm:$0xff] %v919_v17 }
 0x286   : > { %939 = vst [vmem:[#allocation2 + $0x8] sm:$0xff] %v923_v18 }
 0x288   : > { %v902_v23 = vpop.f32.mrf.mxu2  ;;  %v912_v24 = vpop.f32.mrf.mxu3 }
 0x289   : > { %v927_v25 = vadd.f32 %v902_v23, %v778_v19  ;;  %v931_v26 = vadd.f32 %v912_v24, %v782_v20  ;;  %v884_v27 = vpop.f32.mrf.mxu0  ;;  %v894_v28 = vpop.f32.mrf.mxu1 }
 0x28a   : > { %v920_v29 = vadd.f32 %v884_v27, %v771_v21  ;;  %v924_v30 = vadd.f32 %v894_v28, %v775_v22 }
 0x28b   : > { %943 = vst [vmem:[#allocation2 + $0x10] sm:$0xff] %v927_v25 }
 0x28c   : > { %947 = vst [vmem:[#allocation2 + $0x78] sm:$0xff] %v931_v26 }
 0x28d   : > { %936 = vst [vmem:[#allocation2 + $0x18] sm:$0xff] %v920_v29 }
 0x28e   : > { %940 = vst [vmem:[#allocation2 + $0x48] sm:$0xff] %v924_v30 }
 0x290   : > { %v904_v33 = vpop.f32.mrf.mxu2  ;;  %v914_v34 = vpop.f32.mrf.mxu3 }
 0x291   : > { %v928_v35 = vadd.f32 %v904_v33, %v779_v31  ;;  %v932_v36 = vadd.f32 %v914_v34, %v783_v32 }
 0x293   : > { %944 = vst [vmem:[#allocation2 + $0x38] sm:$0xff] %v928_v35 }
 0x294   : > { %948 = vst [vmem:[#allocation2 + $0x28] sm:$0xff] %v932_v36 }
 0x295 PF: > { %p1344_p1 = scmp.ne.s32.totalorder %s1479_s28, 1 }
 0x296   : > { %s969_s29 = sld [smem:[#allocation3]] (!%p1344_p1) }
 0x297   : > { %952 = sbr.rel (%p1344_p1) target bundleno = 720 (0x2d0), region = 97 }
 0x29c   : > { %v953_v37 = vld [vmem:[#allocation2 + $0x30] sm:$0xff]  ;;  %v954_v38 = vld [vmem:[#allocation2] sm:$0xff]  ;;  %v955_v39 = vld [vmem:[#allocation2 + $0x58] sm:$0xff]  ;;  %v1697_v44 = vstv %s969_s29 }
 0x29d   : > { %v956_v40 = vld [vmem:[#allocation2 + $0x18] sm:$0xff]  ;;  %v957_v41 = vld [vmem:[#allocation2 + $0x50] sm:$0xff]  ;;  %v958_v42 = vld [vmem:[#allocation2 + $0x68] sm:$0xff]  ;;  %vm970_vm2 = vcmp.ge.f32.partialorder %v953_v37, 0.0  ;;  %vm971_vm3 = vcmp.ge.f32.partialorder %v954_v38, 0.0  ;;  %vm972_vm4 = vcmp.ge.f32.partialorder %v955_v39, 0.0  ;;  %v987_v45 = vmul.f32 %v1697_v44, %v953_v37 }
 0x29e   : > { %v959_v43 = vld [vmem:[#allocation2 + $0x8] sm:$0xff]  ;;  %vm973_vm5 = vcmp.ge.f32.partialorder %v956_v40, 0.0  ;;  %vm974_vm6 = vcmp.ge.f32.partialorder %v957_v41, 0.0  ;;  %vm975_vm7 = vcmp.ge.f32.partialorder %v958_v42, 0.0  ;;  %v988_v46 = vmul.f32 %v1697_v44, %v954_v38  ;;  %v961_v53 = vld [vmem:[#allocation2 + $0x40] sm:$0xff]  ;;  %v963_v63 = vld [vmem:[#allocation2 + $0x10] sm:$0xff] }
 0x29f   : > { %v989_v47 = vmul.f32 %v1697_v44, %v955_v39  ;;  %v990_v48 = vmul.f32 %v1697_v44, %v956_v40  ;;  %v991_v49 = vmul.f32 %v1697_v44, %v957_v41  ;;  %v992_v50 = vmul.f32 %v1697_v44, %v958_v42  ;;  %v960_v52 = vld [vmem:[#allocation2 + $0x48] sm:$0xff]  ;;  %v962_v62 = vld [vmem:[#allocation2 + $0x20] sm:$0xff]  ;;  %v964_v6 = vld [vmem:[#allocation2 + $0x38] sm:$0xff] }
 0x2a0   : > { %vm976_vm8 = vcmp.ge.f32.partialorder %v959_v43, 0.0  ;;  %v993_v51 = vmul.f32 %v1697_v44, %v959_v43  ;;  %v1003_v54 = vsel %vm970_vm2, %v953_v37, %v987_v45  ;;  %v1004_v55 = vsel %vm971_vm3, %v954_v38, %v988_v46  ;;  %v965_v7 = vld [vmem:[#allocation2 + $0x60] sm:$0xff]  ;;  %v966_v14 = vld [vmem:[#allocation2 + $0x70] sm:$0xff]  ;;  %v967_v21 = vld [vmem:[#allocation2 + $0x78] sm:$0xff] }
 0x2a1   : > { %v1005_v56 = vsel %vm972_vm4, %v955_v39, %v989_v47  ;;  %v1006_v57 = vsel %vm973_vm5, %v956_v40, %v990_v48  ;;  %1019 = vst [vmem:[%s1633_s26] sm:$0xff] %v1003_v54  ;;  %v1056_v58 = vmul.f32 %v1003_v54, %v1003_v54  ;;  %v1035_v59 = vadd.f32 %v1004_v55, %v1003_v54  ;;  %v968_v25 = vld [vmem:[#allocation2 + $0x28] sm:$0xff] }
 0x2a2   : > { %v1057_v60 = vmul.f32 %v1004_v55, %v1004_v55  ;;  %v1058_v61 = vmul.f32 %v1005_v56, %v1005_v56  ;;  %1020 = vst [vmem:[%s1633_s26 + $0x8] sm:$0xff] %v1004_v55  ;;  %v1007_v0 = vsel %vm974_vm6, %v957_v41, %v991_v49  ;;  %vm977_vm9 = vcmp.ge.f32.partialorder %v960_v52, 0.0 }
 0x2a3   : > { %v994_v1 = vmul.f32 %v1697_v44, %v960_v52  ;;  %vm978_vm10 = vcmp.ge.f32.partialorder %v961_v53, 0.0  ;;  %1021 = vst [vmem:[%s1633_s26 + $0x10] sm:$0xff] %v1005_v56  ;;  %v1036_v3 = vadd.f32 %v1035_v59, %v1005_v56  ;;  %v1059_v4 = vmul.f32 %v1006_v57, %v1006_v57 }
 0x2a4   : > { %v1072_v2 = vadd.f32 %v1057_v60, %v1056_v58  ;;  %v1008_v5 = vsel %vm975_vm7, %v958_v42, %v992_v50  ;;  %1022 = vst [vmem:[%s1633_s26 + $0x18] sm:$0xff] %v1006_v57  ;;  %v1009_v8 = vsel %vm976_vm8, %v959_v43, %v993_v51  ;;  %v995_v9 = vmul.f32 %v1697_v44, %v961_v53 }
 0x2a5   : > { %vm979_vm11 = vcmp.ge.f32.partialorder %v962_v62, 0.0  ;;  %vm980_vm12 = vcmp.ge.f32.partialorder %v963_v63, 0.0  ;;  %v1037_v11 = vadd.f32 %v1036_v3, %v1006_v57  ;;  %1023 = vst [vmem:[%s1633_s26 + $0x20] sm:$0xff] %v1007_v0  ;;  %v1060_v12 = vmul.f32 %v1007_v0, %v1007_v0 }
 0x2a6   : > { %v1073_v10 = vadd.f32 %v1072_v2, %v1058_v61  ;;  %v996_v13 = vmul.f32 %v1697_v44, %v962_v62  ;;  %1024 = vst [vmem:[%s1633_s26 + $0x28] sm:$0xff] %v1008_v5  ;;  %v1061_v15 = vmul.f32 %v1008_v5, %v1008_v5  ;;  %v997_v16 = vmul.f32 %v1697_v44, %v963_v63 }
 0x2a7   : > { %vm981_vm13 = vcmp.ge.f32.partialorder %v964_v6, 0.0  ;;  %vm982_vm14 = vcmp.ge.f32.partialorder %v965_v7, 0.0  ;;  %v1038_v18 = vadd.f32 %v1037_v11, %v1007_v0  ;;  %1025 = vst [vmem:[%s1633_s26 + $0x30] sm:$0xff] %v1009_v8  ;;  %v1010_v19 = vsel %vm977_vm9, %v960_v52, %v994_v1 }
 0x2a8   : > { %v1074_v17 = vadd.f32 %v1073_v10, %v1059_v4  ;;  %v998_v20 = vmul.f32 %v1697_v44, %v964_v6  ;;  %v1062_v22 = vmul.f32 %v1009_v8, %v1009_v8  ;;  %1026 = vst [vmem:[%s1633_s26 + $0x38] sm:$0xff] %v1010_v19  ;;  %v1011_v23 = vsel %vm978_vm10, %v961_v53, %v995_v9 }
 0x2a9   : > { %v999_v24 = vmul.f32 %v1697_v44, %v965_v7  ;;  %vm983_vm15 = vcmp.ge.f32.partialorder %v966_v14, 0.0  ;;  %v1039_v27 = vadd.f32 %v1038_v18, %v1008_v5  ;;  %1027 = vst [vmem:[%s1633_s26 + $0x40] sm:$0xff] %v1011_v23  ;;  %v1012_v28 = vsel %vm979_vm11, %v962_v62, %v996_v13 }
 0x2aa   : > { %v1075_v26 = vadd.f32 %v1074_v17, %v1060_v12  ;;  %v1000_v29 = vmul.f32 %v1697_v44, %v966_v14  ;;  %v1063_v30 = vmul.f32 %v1010_v19, %v1010_v19  ;;  %1028 = vst [vmem:[%s1633_s26 + $0x48] sm:$0xff] %v1012_v28  ;;  %v1013_v31 = vsel %vm980_vm12, %v963_v63, %v997_v16 }
 0x2ab   : > { %vm984_vm0 = vcmp.ge.f32.partialorder %v967_v21, 0.0  ;;  %v1001_v32 = vmul.f32 %v1697_v44, %v967_v21  ;;  %v1040_v34 = vadd.f32 %v1039_v27, %v1009_v8  ;;  %1029 = vst [vmem:[%s1633_s26 + $0x50] sm:$0xff] %v1013_v31  ;;  %v1014_v35 = vsel %vm981_vm13, %v964_v6, %v998_v20 }
 0x2ac   : > { %v1076_v33 = vadd.f32 %v1075_v26, %v1061_v15  ;;  %v1002_v36 = vmul.f32 %v1697_v44, %v968_v25  ;;  %1030 = vst [vmem:[%s1633_s26 + $0x58] sm:$0xff] %v1014_v35  ;;  %v1015_v37 = vsel %vm982_vm14, %v965_v7, %v999_v24  ;;  %vm985_vm1 = vcmp.ge.f32.partialorder %v968_v25, 0.0 }
 0x2ad   : > { %v1041_v39 = vadd.f32 %v1040_v34, %v1010_v19  ;;  %v1064_v40 = vmul.f32 %v1011_v23, %v1011_v23  ;;  %1031 = vst [vmem:[%s1633_s26 + $0x60] sm:$0xff] %v1015_v37  ;;  %v1016_v41 = vsel %vm983_vm15, %v966_v14, %v1000_v29  ;;  %v1017_v42 = vsel %vm984_vm0, %v967_v21, %v1001_v32 }
 0x2ae   : > { %v1077_v38 = vadd.f32 %v1076_v33, %v1062_v22  ;;  %1032 = vst [vmem:[%s1633_s26 + $0x68] sm:$0xff] %v1016_v41  ;;  %v1065_v46 = vmul.f32 %v1012_v28, %v1012_v28  ;;  %v1018_v47 = vsel %vm985_vm1, %v968_v25, %v1002_v36  ;;  %v1066_v49 = vmul.f32 %v1013_v31, %v1013_v31 }
 0x2af   : > { %v1042_v45 = vadd.f32 %v1041_v39, %v1011_v23  ;;  %1033 = vst [vmem:[%s1633_s26 + $0x70] sm:$0xff] %v1017_v42  ;;  %v1067_v52 = vmul.f32 %v1014_v35, %v1014_v35  ;;  %v1068_v55 = vmul.f32 %v1015_v37, %v1015_v37  ;;  %v1069_v58 = vmul.f32 %v1016_v41, %v1016_v41 }
 0x2b0   : > { %v1078_v43 = vadd.f32 %v1077_v38, %v1063_v30  ;;  %1034 = vst [vmem:[%s1633_s26 + $0x78] sm:$0xff] %v1018_v47  ;;  %v1070_v61 = vmul.f32 %v1017_v42, %v1017_v42  ;;  %v1071_v0 = vmul.f32 %v1018_v47, %v1018_v47  ;;  %vm1093_vm2 = vcmask 1040384  }
 0x2b1   : > { %v1043_v48 = vadd.f32 %v1042_v45, %v1012_v28 }
 0x2b2   : > { %v1079_v44 = vadd.f32 %v1078_v43, %v1064_v40 }
 0x2b3   : > { %v1044_v51 = vadd.f32 %v1043_v48, %v1013_v31 }
 0x2b4   : > { %v1080_v50 = vadd.f32 %v1079_v44, %v1065_v46 }
 0x2b5   : > { %v1045_v54 = vadd.f32 %v1044_v51, %v1014_v35 }
 0x2b6   : > { %v1081_v53 = vadd.f32 %v1080_v50, %v1066_v49 }
 0x2b7   : > { %v1046_v57 = vadd.f32 %v1045_v54, %v1015_v37 }
 0x2b8   : > { %v1082_v56 = vadd.f32 %v1081_v53, %v1067_v52 }
 0x2b9   : > { %v1047_v60 = vadd.f32 %v1046_v57, %v1016_v41 }
 0x2ba   : > { %v1083_v59 = vadd.f32 %v1082_v56, %v1068_v55 }
 0x2bb   : > { %v1048_v63 = vadd.f32 %v1047_v60, %v1017_v42 }
 0x2bc   : > { %v1084_v62 = vadd.f32 %v1083_v59, %v1069_v58 }
 0x2bd   : > { %v1049_v2 = vadd.f32 %v1048_v63, %v1018_v47 }
 0x2be   : > { %v1085_v1 = vadd.f32 %v1084_v62, %v1070_v61 }
 0x2bf   : > { %v1050_v3 = vrot.slane %v1049_v2, 4 }
 0x2c0   : > { %v1086_v4 = vadd.f32 %v1085_v1, %v1071_v0 }
 0x2c1   : > { %v1051_v5 = vadd.f32 %v1050_v3, %v1049_v2 }
 0x2c2   : > { %v1087_v6 = vrot.slane %v1086_v4, 4 }
 0x2c3   : > { %v1052_v7 = vrot.slane %v1051_v5, 2 }
 0x2c4   : > { %v1088_v8 = vadd.f32 %v1087_v6, %v1086_v4 }
 0x2c5   : > { %v1053_v9 = vadd.f32 %v1052_v7, %v1051_v5 }
 0x2c6   : > { %v1089_v10 = vrot.slane %v1088_v8, 2 }
 0x2c7   : > { %v1054_v11 = vrot.slane %v1053_v9, 1 }
 0x2c8   : > { %v1090_v12 = vadd.f32 %v1089_v10, %v1088_v8 }
 0x2c9   : > { %v1055_v13 = vadd.f32 %v1054_v11, %v1053_v9 }
 0x2ca   : > { %v1091_v14 = vrot.slane %v1090_v12, 1 }
 0x2cc   : > { %v1092_v15 = vadd.f32 %v1091_v14, %v1090_v12 }
 0x2ce   : > { %v1094_v16 = vsel %vm1093_vm2, %v1055_v13, %v1092_v15 }
 0x2cf   : > { %1095 = vst [vmem:[%s1638_s1] sm:$0x3] %v1094_v16 }
 0x2d0 PF: > { %s19_s9 = sadd.s32 1, %s1495_s9   ;;  %s1778_s26 = smov %s1475_s27 }
 0x2d1   : > { %p16_p2 = scmp.ge.s32.totalorder %s19_s9, 6   ;;  %s1779_s27 = smov %s1591_s15 }
 0x2d2   : > { %s1780_s28 = smov %s1487_s30  ;;  %s1781_s29 = smov %s1491_s8 }
 0x2d3   : > { %s1782_s30 = smov %s1785_s5  ;;  %s1783_s8 = smov %s1789_s10 }
 0x2d4   :  { %18 = sbr.rel (!%p16_p2) target bundleno = 7 (0x7), region = 147 }

</bundles_post_ra>
